<compile_context>
chip_gen: v7x
topology: tpu7x:2x2x1
jax: 0.10.0
libtpu: 0.0.40
codegen_flags: <defaults>
</compile_context>

<pallas_src>
import functools

import jax
import jax.numpy as jnp
from jax.experimental import pallas as pl
from jax.experimental.pallas import tpu as pltpu

_LANE = 128
_SUBLANE = 8


def _round_up(n, m):
    return ((n + m - 1) // m) * m


def _mlp_kernel(x_ref, w1_ref, w2_ref, w3_ref, bias_ref, o_ref,
                *, h_p, out_p, out_size):
    """One batch tile: x(bm, in_size) f32 -> o(bm, out_size) f32."""
    x = x_ref[...].astype(jnp.bfloat16)      # bf16 MXU operands, f32 accumulate
    b = bias_ref[...]                        # (3, nb) packed f32 biases, zero-padded
    b1 = b[0:1, :h_p]
    b2 = b[1:2, :h_p]
    b3 = b[2:3, :out_p]

    h1 = jnp.dot(x, w1_ref[...], preferred_element_type=jnp.float32) + b1
    h1 = jnp.maximum(h1, 0.0).astype(jnp.bfloat16)        # relu1
    h2 = jnp.dot(h1, w2_ref[...], preferred_element_type=jnp.float32) + b2
    h2 = jnp.maximum(h2, 0.0).astype(jnp.bfloat16)        # relu2
    out = jnp.dot(h2, w3_ref[...], preferred_element_type=jnp.float32) + b3
    # Narrow, native-width store (masked vst) -- writeback is out_size lanes,
    # not a padded 128-wide slab.
    o_ref[...] = out[:, :out_size].astype(o_ref.dtype)


def prepare_params(params):
    """One-time weight padding / bias packing / bf16 cast (hoisted out of the
    per-call forward path -- params do not change between forward calls)."""
    w1, b1 = params["w1"], params["b1"]
    w2, b2 = params["w2"], params["b2"]
    w3, b3 = params["w3"], params["b3"]

    in_size, hidden = w1.shape
    out_size = w3.shape[1]
    h_p = _round_up(hidden, _LANE)
    out_p = _round_up(out_size, _LANE)
    nb = max(h_p, out_p)

    bf16, f32 = jnp.bfloat16, jnp.float32
    # Zero padding is exact: padded hidden columns stay 0 through bias+ReLU,
    # padded output columns are never stored.
    w1_p = jnp.zeros((in_size, h_p), bf16).at[:, :hidden].set(w1.astype(bf16))
    w2_p = jnp.zeros((h_p, h_p), bf16).at[:hidden, :hidden].set(w2.astype(bf16))
    w3_p = jnp.zeros((h_p, out_p), bf16).at[:hidden, :out_size].set(w3.astype(bf16))
    bias_p = (jnp.zeros((3, nb), f32)
              .at[0, :hidden].set(b1.reshape(-1).astype(f32))
              .at[1, :hidden].set(b2.reshape(-1).astype(f32))
              .at[2, :out_size].set(b3.reshape(-1).astype(f32)))
    return dict(w1=w1_p, w2=w2_p, w3=w3_p, bias=bias_p,
                in_size=in_size, hidden=hidden, out_size=out_size,
                h_p=h_p, out_p=out_p)


def quantile_regression_net(x, prepared, *, block_batch=1024):
    """Forward pass of QuantileRegressionNet via a fused, batch-tiled Pallas kernel.

    x:        (batch, input_size) float32
    prepared: output of prepare_params(params)
    """
    in_size = prepared["in_size"]
    out_size = prepared["out_size"]
    h_p, out_p = prepared["h_p"], prepared["out_p"]

    batch = x.shape[0]
    assert x.shape[1] == in_size

    # Batch tile: sublane-aligned, capped at block_batch, and additionally
    # capped so the grid has >=4 steps when batch allows it (v7x megacore:
    # give both TensorCores work; harmless on single-TC v5e/v6e).
    bm = min(block_batch, _round_up(max(1, -(-batch // 4)), _SUBLANE))
    bm = max(bm, _SUBLANE)
    batch_p = _round_up(batch, bm)

    x = x.astype(jnp.float32)
    if batch_p != batch:
        x = jnp.pad(x, ((0, batch_p - batch), (0, 0)))

    # Weights / packed bias: full-array blocks with constant block index ->
    # DMA'd once, resident in VMEM across all batch-grid steps.
    const = lambda a: pl.BlockSpec(a.shape, lambda i: (0,) * a.ndim)

    kernel = functools.partial(_mlp_kernel, h_p=h_p, out_p=out_p, out_size=out_size)

    out = pl.pallas_call(
        kernel,
        out_shape=jax.ShapeDtypeStruct((batch_p, out_size), jnp.float32),
        grid=(batch_p // bm,),
        in_specs=[
            pl.BlockSpec((bm, in_size), lambda i: (i, 0)),   # x: native width, batch-tiled
            const(prepared["w1"]),
            const(prepared["w2"]),
            const(prepared["w3"]),
            const(prepared["bias"]),
        ],
        out_specs=pl.BlockSpec((bm, out_size), lambda i: (i, 0)),
        compiler_params=pltpu.CompilerParams(
            dimension_semantics=("parallel",),   # batch tiles independent
        ),
    )(x, prepared["w1"], prepared["w2"], prepared["w3"], prepared["bias"])

    if batch_p != batch:
        out = out[:batch]
    return out


def init_params(key, input_size, output_size, hidden_size):
    """Deterministic PyTorch-style Linear init: U(-1/sqrt(fan_in), 1/sqrt(fan_in))."""
    ks = jax.random.split(key, 6)

    def linear(kw, kb, fan_in, fan_out):
        bound = 1.0 / jnp.sqrt(fan_in)
        w = jax.random.uniform(kw, (fan_in, fan_out), jnp.float32, -bound, bound)
        b = jax.random.uniform(kb, (1, fan_out), jnp.float32, -bound, bound)
        return w, b

    w1, b1 = linear(ks[0], ks[1], input_size, hidden_size)
    w2, b2 = linear(ks[2], ks[3], hidden_size, hidden_size)
    w3, b3 = linear(ks[4], ks[5], hidden_size, output_size)
    return {"w1": w1, "b1": b1, "w2": w2, "b2": b2, "w3": w3, "b3": b3}


if __name__ == "__main__":
    # Small shapes consistent with the module: tabular input, two quantile
    # outputs.  batch=10 is deliberately not tile-aligned, and the >=4-step
    # cap gives bm=8 -> a 2-step batch grid, exercising padding + pipelining.
    batch, input_size, hidden_size, output_size = 10, 16, 32, 2

    key = jax.random.PRNGKey(0)
    kx, kp = jax.random.split(key)
    x = jax.random.normal(kx, (batch, input_size), dtype=jnp.float32)
    params = init_params(kp, input_size, output_size, hidden_size)

    prepared = prepare_params(params)          # hoisted one-time padding / casting
    out = quantile_regression_net(x, prepared)
    out = jax.block_until_ready(out)

    # Pure-JAX reference using the same bf16-operand / f32-accumulate matmuls.
    bf16 = jnp.bfloat16
    h = jnp.dot(x.astype(bf16), params["w1"].astype(bf16),
                preferred_element_type=jnp.float32) + params["b1"]
    h = jnp.maximum(h, 0.0).astype(bf16)
    h = jnp.dot(h, params["w2"].astype(bf16),
                preferred_element_type=jnp.float32) + params["b2"]
    h = jnp.maximum(h, 0.0).astype(bf16)
    ref = jnp.dot(h, params["w3"].astype(bf16),
                  preferred_element_type=jnp.float32) + params["b3"]

    assert out.shape == (batch, output_size)
    assert jnp.allclose(out, ref, atol=1e-2, rtol=1e-2), (
        float(jnp.max(jnp.abs(out - ref))))

    print("KERNEL_OK")
</pallas_src>

<mosaic_0001>
module attributes {stable_mosaic.version = 11 : i64} {
  func.func @_mlp_kernel(%arg0: i32, %arg1: memref<8x16xf32, #tpu.memory_space<vmem>>, %arg2: memref<16x128xbf16, #tpu.memory_space<vmem>>, %arg3: memref<128x128xbf16, #tpu.memory_space<vmem>>, %arg4: memref<128x128xbf16, #tpu.memory_space<vmem>>, %arg5: memref<3x128xf32, #tpu.memory_space<vmem>>, %arg6: memref<8x2xf32, #tpu.memory_space<vmem>>) attributes {dimension_semantics = [#tpu.dimension_semantics<parallel>], iteration_bounds = array<i64: 2>, scalar_prefetch = 0 : i64, scratch_operands = 0 : i64, tpu.core_type = #tpu.core_type<tc>, window_params = [{transform_indices = @transform_0, window_bounds = array<i64: 8, 16>}, {pipeline_mode = #tpu.pipeline_mode<synchronous>, transform_indices = @transform_1, window_bounds = array<i64: 16, 128>}, {pipeline_mode = #tpu.pipeline_mode<synchronous>, transform_indices = @transform_2, window_bounds = array<i64: 128, 128>}, {pipeline_mode = #tpu.pipeline_mode<synchronous>, transform_indices = @transform_3, window_bounds = array<i64: 128, 128>}, {pipeline_mode = #tpu.pipeline_mode<synchronous>, transform_indices = @transform_4, window_bounds = array<i64: 3, 128>}, {transform_indices = @transform_5, window_bounds = array<i64: 8, 2>}]} {
    %c0 = arith.constant 0 : index
    %c0_0 = arith.constant 0 : index
    %0 = vector.load %arg1[%c0, %c0_0] : memref<8x16xf32, #tpu.memory_space<vmem>>, vector<8x16xf32>
    %1 = arith.truncf %0 : vector<8x16xf32> to vector<8x16xbf16>
    %c0_1 = arith.constant 0 : index
    %c0_2 = arith.constant 0 : index
    %2 = vector.load %arg5[%c0_1, %c0_2] : memref<3x128xf32, #tpu.memory_space<vmem>>, vector<3x128xf32>
    %3 = vector.extract_strided_slice %2 {offsets = [0, 0], sizes = [1, 128], strides = [1, 1]} : vector<3x128xf32> to vector<1x128xf32>
    %4 = vector.extract_strided_slice %2 {offsets = [1, 0], sizes = [1, 128], strides = [1, 1]} : vector<3x128xf32> to vector<1x128xf32>
    %5 = vector.extract_strided_slice %2 {offsets = [2, 0], sizes = [1, 128], strides = [1, 1]} : vector<3x128xf32> to vector<1x128xf32>
    %c0_3 = arith.constant 0 : index
    %c0_4 = arith.constant 0 : index
    %6 = vector.load %arg2[%c0_3, %c0_4] : memref<16x128xbf16, #tpu.memory_space<vmem>>, vector<16x128xbf16>
    %cst = arith.constant dense<0.000000e+00> : vector<8x128xf32>
    %7 = tpu.matmul %1, %6, %cst {dimension_numbers = #tpu.dot_dimension_numbers<[1], [0], [0], [1], [0, 0, 1, 1], [], []>} : vector<8x16xbf16>, vector<16x128xbf16>, vector<8x128xf32> -> vector<8x128xf32>
    %8 = vector.broadcast %3 : vector<1x128xf32> to vector<8x128xf32>
    %9 = arith.addf %7, %8 : vector<8x128xf32>
    %cst_5 = arith.constant 0.000000e+00 : f32
    %10 = vector.broadcast %cst_5 : f32 to vector<8x128xf32>
    %11 = arith.maximumf %9, %10 : vector<8x128xf32>
    %12 = arith.truncf %11 : vector<8x128xf32> to vector<8x128xbf16>
    %c0_6 = arith.constant 0 : index
    %c0_7 = arith.constant 0 : index
    %13 = vector.load %arg3[%c0_6, %c0_7] : memref<128x128xbf16, #tpu.memory_space<vmem>>, vector<128x128xbf16>
    %cst_8 = arith.constant dense<0.000000e+00> : vector<8x128xf32>
    %14 = tpu.matmul %12, %13, %cst_8 {dimension_numbers = #tpu.dot_dimension_numbers<[1], [0], [0], [1], [0, 0, 1, 1], [], []>} : vector<8x128xbf16>, vector<128x128xbf16>, vector<8x128xf32> -> vector<8x128xf32>
    %15 = vector.broadcast %4 : vector<1x128xf32> to vector<8x128xf32>
    %16 = arith.addf %14, %15 : vector<8x128xf32>
    %cst_9 = arith.constant 0.000000e+00 : f32
    %17 = vector.broadcast %cst_9 : f32 to vector<8x128xf32>
    %18 = arith.maximumf %16, %17 : vector<8x128xf32>
    %19 = arith.truncf %18 : vector<8x128xf32> to vector<8x128xbf16>
    %c0_10 = arith.constant 0 : index
    %c0_11 = arith.constant 0 : index
    %20 = vector.load %arg4[%c0_10, %c0_11] : memref<128x128xbf16, #tpu.memory_space<vmem>>, vector<128x128xbf16>
    %cst_12 = arith.constant dense<0.000000e+00> : vector<8x128xf32>
    %21 = tpu.matmul %19, %20, %cst_12 {dimension_numbers = #tpu.dot_dimension_numbers<[1], [0], [0], [1], [0, 0, 1, 1], [], []>} : vector<8x128xbf16>, vector<128x128xbf16>, vector<8x128xf32> -> vector<8x128xf32>
    %22 = vector.broadcast %5 : vector<1x128xf32> to vector<8x128xf32>
    %23 = arith.addf %21, %22 : vector<8x128xf32>
    %24 = vector.extract_strided_slice %23 {offsets = [0, 0], sizes = [8, 2], strides = [1, 1]} : vector<8x128xf32> to vector<8x2xf32>
    %c0_13 = arith.constant 0 : index
    %c0_14 = arith.constant 0 : index
    %25 = vector.load %arg6[%c0_13, %c0_14] : memref<8x2xf32, #tpu.memory_space<vmem>>, vector<8x2xf32>
    tpu.vector_store %arg6[%c0_13, %c0_14], %24 {strides = array<i32>} : memref<8x2xf32, #tpu.memory_space<vmem>>, vector<8x2xf32>,
    return
  }
  func.func @transform_0(%arg0: i32) -> (i32, i32) {
    %c0_i32 = arith.constant 0 : i32
    %c0_i32_0 = arith.constant 0 : i32
    return %arg0, %c0_i32 : i32, i32
  }
  func.func @transform_1(%arg0: i32) -> (i32, i32) {
    %c0_i32 = arith.constant 0 : i32
    %c0_i32_0 = arith.constant 0 : i32
    %c0_i32_1 = arith.constant 0 : i32
    return %c0_i32, %c0_i32_0 : i32, i32
  }
  func.func @transform_2(%arg0: i32) -> (i32, i32) {
    %c0_i32 = arith.constant 0 : i32
    %c0_i32_0 = arith.constant 0 : i32
    %c0_i32_1 = arith.constant 0 : i32
    return %c0_i32, %c0_i32_0 : i32, i32
  }
  func.func @transform_3(%arg0: i32) -> (i32, i32) {
    %c0_i32 = arith.constant 0 : i32
    %c0_i32_0 = arith.constant 0 : i32
    %c0_i32_1 = arith.constant 0 : i32
    return %c0_i32, %c0_i32_0 : i32, i32
  }
  func.func @transform_4(%arg0: i32) -> (i32, i32) {
    %c0_i32 = arith.constant 0 : i32
    %c0_i32_0 = arith.constant 0 : i32
    %c0_i32_1 = arith.constant 0 : i32
    return %c0_i32, %c0_i32_0 : i32, i32
  }
  func.func @transform_5(%arg0: i32) -> (i32, i32) {
    %c0_i32 = arith.constant 0 : i32
    %c0_i32_0 = arith.constant 0 : i32
    return %arg0, %c0_i32 : i32, i32
  }
}

</mosaic_0001>

<bundles_post_ra>
// kernel: tpu_custom_call.1
= control target key start
LH: loop header
LB: loop body
LE: loop exit
PB: predicated region body
PF: predicated region fallthrough
CT: control target
= control target key end

     0   :  { %10 = vsyncpa [#allocation3], 0  ;;  %s1283_s0 = inlined_call_operand.hbm [shape: f32[16,16], index: 0, kind: input, shape index: {}]   ;;  %s1284_s1 = inlined_call_operand.hbm [shape: bf16[16,128], index: 1, kind: input, shape index: {}]   ;;  %s1285_s2 = inlined_call_operand.hbm [shape: bf16[128,128], index: 2, kind: input, shape index: {}]   ;;  %s1286_s3 = inlined_call_operand.hbm [shape: bf16[128,128], index: 3, kind: input, shape index: {}]   ;;  %s1287_s4 = inlined_call_operand.vmem [shape: f32[3,128], index: 4, kind: input, shape index: {}]   ;;  %s1288_s5 = inlined_call_operand.vmem [shape: f32[16,2], index: 5, kind: output, shape index: {}]  }
   0x1   :  { %12 = vsyncpa [#allocation3 + $0x1], 0 }
   0x2   :  { %13 = vsyncpa [#allocation5], 0 }
   0x3   :  { %14 = vsyncpa [#allocation8], 0  ;;  %s1047_s18 = smov 0   ;;  %s1049_s19 = smov 0  }
   0x4   :  { %s1051_s20 = smov 0   ;;  %s1053_s21 = smov 0  }
   0x5 LB: > { %s1066_s22 = sadd.s32 4294967295, %s1007_s21   ;;  %p40_p0 = scmp.ne.s32.totalorder %s999_s19, %s995_s18  ;;  %s1007_s21 = sphi %s1053_s21, %s1306_s21   ;;  %s1003_s20 = sphi %s1051_s20, %s1305_s20   ;;  %s999_s19 = sphi %s1049_s19, %s1304_s19   ;;  %s995_s18 = sphi %s1047_s18, %s1303_s18  }
   0x6   : > { %p1289_p1 = scmp.eq.s32.totalorder %s1066_s22, 0  ;;  %p661_p2 = scmp.ge.s32.totalorder %s1007_s21, 1 }
   0x7   : > { %p161_p3 = scmp.lt.s32.totalorder %s1007_s21, 3  ;;  %s1009_s25 = smov [#allocation4]  }
   0x8   : > { %p1074_p4 = por %p1289_p1, %p40_p0  ;;  %s173_s26 = sshll.u32 %s1009_s25, 4  ;;  %s1082_s26 = int_to_ptr.vmem [resolvable:$true] %s173_s26 }
   0x9   : > { %p1078_p5 = pnand %p661_p2, %p161_p3  ;;  %s1010_s28 = smov [#allocation6]  }
   0xa   : > { %s1292_s23 = scalar_select %p1074_p4, 1, 0 }
   0xb   : > { %s1293_s24 = scalar_select %p1078_p5, 1, 0 }
   0xc   : > { %p774_p6 = pneg %p1078_p5  ;;  %s186_s29 = sshll.u32 %s1010_s28, 4  ;;  %s1092_s29 = int_to_ptr.vmem [resolvable:$true] %s186_s29 }
   0xd   : > { %s1011_s30 = smov [#allocation7]   ;;  %s851_s9 = scalar_lea.hbm %s1284_s1, 128 }
   0xe   : > { %p1088_p7 = pnand %p774_p6, %p1289_p1  ;;  %s1094_s6 = sshll.u32 %s1011_s30, 4  ;;  %s200_s6 = int_to_ptr.vmem [resolvable:$true] %s1094_s6 }
   0xf   : > { %p852_p8 = scmp.ne.s32.totalorder %s1284_s1, %s851_s9  ;;  %p858_p12 = scmp.lt.u32.totalorder %s851_s9, %s1284_s1 }
  0x10   : > { %p1104_p9 = pneg %p1088_p7 }
  0x12   : > { %p854_p10 = pnand %p1104_p9, %p852_p8 }
  0x14   : > { %p855_p11 = pneg %p854_p10 }
  0x16   : > { %p860_p13 = pnand %p858_p12, %p855_p11 }
  0x18   : > { %863 = shalt.err (!%p860_p13)
}
  0x19   : > { %s864_s15 = scalar_lea.vmem %s1082_s26, 128  ;;  %p872_p6 = scmp.lt.s32.totalorder %s1082_s26, %s1082_s26 }
  0x1a   : > { %p865_p0 = scmp.ne.s32.totalorder %s1082_s26, %s864_s15  ;;  %p873_p1 = scmp.lt.s32.totalorder %s864_s15, %s864_s15 }
  0x1c   : > { %p867_p2 = pnand %p865_p0, %p1104_p9  ;;  %p874_p8 = por %p873_p1, %p872_p6 }
  0x1e   : > { %p868_p3 = pneg %p867_p2 }
  0x20   : > { %p875_p10 = pnand %p874_p8, %p868_p3 }
  0x22   : > { %878 = shalt.err (!%p875_p10)
}
  0x23   : > { %s1012_s16 = smov 64   ;;  %s1013_s17 = smov 4  }
  0x24   : > { %777 = dma.hbm_to_vmem [thread:$0]  (!%p1088_p7), %s1284_s1, 128, %s1082_s26, [#allocation5], %s1012_s16, %s1012_s16, %s1013_s17  }
  0x25   : > { %s879_s7 = scalar_lea.hbm %s1285_s2, 1024 }
  0x26   : > { %p880_p1 = scmp.ne.s32.totalorder %s1285_s2, %s879_s7  ;;  %p886_p13 = scmp.lt.u32.totalorder %s879_s7, %s1285_s2 }
  0x28   : > { %p882_p11 = pnand %p880_p1, %p1104_p9 }
  0x2a   : > { %p883_p12 = pneg %p882_p11 }
  0x2c   : > { %p888_p0 = pnand %p886_p13, %p883_p12 }
  0x2e   : > { %891 = shalt.err (!%p888_p0)
}
  0x2f   : > { %s892_s26 = scalar_lea.vmem %s1092_s29, 1024  ;;  %p900_p8 = scmp.lt.s32.totalorder %s1092_s29, %s1092_s29 }
  0x30   : > { %p893_p2 = scmp.ne.s32.totalorder %s1092_s29, %s892_s26  ;;  %p901_p10 = scmp.lt.s32.totalorder %s892_s26, %s892_s26 }
  0x32   : > { %p895_p3 = pnand %p893_p2, %p1104_p9  ;;  %p902_p1 = por %p901_p10, %p900_p8 }
  0x34   : > { %p896_p6 = pneg %p895_p3 }
  0x36   : > { %p903_p11 = pnand %p902_p1, %p896_p6 }
  0x38   : > { %906 = shalt.err (!%p903_p11)
}
  0x39   : > { %780 = dma.hbm_to_vmem [thread:$0]  (!%p1088_p7), %s1285_s2, 1024, %s1092_s29, [#allocation5], %s1012_s16, %s1012_s16, %s1013_s17  }
  0x3a   : > { %s907_s25 = scalar_lea.hbm %s1286_s3, 1024 }
  0x3b   : > { %p908_p12 = scmp.ne.s32.totalorder %s1286_s3, %s907_s25  ;;  %p914_p2 = scmp.lt.u32.totalorder %s907_s25, %s1286_s3 }
  0x3d   : > { %p910_p13 = pnand %p908_p12, %p1104_p9 }
  0x3f   : > { %p911_p0 = pneg %p910_p13 }
  0x41   : > { %p916_p3 = pnand %p914_p2, %p911_p0 }
  0x43   : > { %919 = shalt.err (!%p916_p3)
}
  0x44   : > { %s920_s9 = scalar_lea.vmem %s200_s6, 1024  ;;  %p928_p1 = scmp.lt.s32.totalorder %s200_s6, %s200_s6 }
  0x45   : > { %p921_p6 = scmp.ne.s32.totalorder %s200_s6, %s920_s9  ;;  %p929_p11 = scmp.lt.s32.totalorder %s920_s9, %s920_s9 }
  0x47   : > { %p923_p8 = pnand %p921_p6, %p1104_p9  ;;  %p930_p4 = por %p929_p11, %p928_p1 }
  0x49   : > { %p924_p10 = pneg %p923_p8 }
  0x4b   : > { %p931_p5 = pnand %p930_p4, %p924_p10 }
  0x4d   : > { %934 = shalt.err (!%p931_p5)
}
  0x4e   : > { %783 = dma.hbm_to_vmem [thread:$0]  (!%p1088_p7), %s1286_s3, 1024, %s200_s6, [#allocation8], %s1012_s16, %s1012_s16, %s1013_s17  }
  0x4f   : > { %s1177_s12 = sadd.s32 1, %s1007_s21   ;;  %s27_s11 = sadd.s32 1, %s1003_s20 }
  0x50   : > { %s24_s27 = ssub.s32 %s1007_s21, %s1177_s12  ;;  %p34_p5 = scmp.ne.s32.totalorder %s1003_s20, %s999_s19 }
  0x51   : > { %p25_p4 = scmp.eq.s32.totalorder %s24_s27, 0  ;;  %p35_p9 = scmp.eq.s32.totalorder %s1007_s21, 0 }
  0x52   : > { %p791_p12 = scmp.lt.s32.totalorder %s1007_s21, 2  ;;  %s216_s13 = sand.u32 1, %s1003_s20  }
  0x53   : > { %s1187_s26 = scalar_select %p25_p4, %s1003_s20, %s27_s11  }
  0x54   : > { %p36_p13 = por %p35_p9, %p34_p5  ;;  %s666_s14 = sshll.u32 %s216_s13, 3 }
  0x55   : > { %s667_s15 = sshll.u32 %s1007_s21, 7  ;;  %s220_s6 = scalar_lea.vmem [#allocation2], %s666_s14 }
  0x56   : > { %s1194_s28 = scalar_lea.hbm %s1283_s0, %s667_s15  ;;  %s227_s16 = sshll.u32 %s220_s6, 4  ;;  %s1196_s16 = int_to_ptr.vmem [resolvable:$true] %s227_s16 }
  0x57   : > { %p1198_p7 = pnand %p791_p12, %p36_p13  ;;  %s217_s21 = scalar_lea.sflag [#allocation3], %s216_s13 }
  0x58   : > { %s935_s30 = scalar_lea.hbm %s1194_s28, 128  ;;  %s940_s9 = scalar_lea.hbm %s1283_s0, 256 }
  0x59   : > { %p936_p0 = scmp.ne.s32.totalorder %s1194_s28, %s935_s30  ;;  %p937_p2 = pneg %p1198_p7 }
  0x5a   : > { %p941_p8 = scmp.lt.u32.totalorder %s1194_s28, %s1283_s0  ;;  %p942_p10 = scmp.lt.u32.totalorder %s940_s9, %s935_s30 }
  0x5b   : > { %p938_p3 = pnand %p937_p2, %p936_p0  ;;  %p944_p11 = scmp.lt.u32.totalorder %s935_s30, %s1194_s28 }
  0x5c   : > { %p943_p1 = por %p942_p10, %p941_p8 }
  0x5d   : > { %p939_p6 = pneg %p938_p3 }
  0x5e   : > { %p945_p4 = por %p944_p11, %p943_p1 }
  0x60   : > { %p946_p5 = pnand %p945_p4, %p939_p6 }
  0x62   : > { %949 = shalt.err (!%p946_p5)
}
  0x63   : > { %s950_s27 = scalar_lea.vmem %s1196_s16, 128  ;;  %s1014_s11 = smov [#allocation2]  }
  0x64   : > { %p951_p9 = scmp.ne.s32.totalorder %s1196_s16, %s950_s27  ;;  %s955_s13 = sshll.u32 %s1014_s11, 4  ;;  %s956_s13 = int_to_ptr.vmem [resolvable:$false] %s955_s13 }
  0x65   : > { %s957_s14 = scalar_lea.vmem %s956_s13, 256  ;;  %p958_p0 = scmp.lt.s32.totalorder %s1196_s16, %s956_s13 }
  0x66   : > { %p953_p12 = pnand %p951_p9, %p937_p2  ;;  %p959_p3 = scmp.lt.s32.totalorder %s957_s14, %s950_s27 }
  0x68   : > { %p954_p13 = pneg %p953_p12  ;;  %p960_p8 = por %p959_p3, %p958_p0 }
  0x6a   : > { %p961_p10 = pnand %p960_p8, %p954_p13 }
  0x6c   : > { %964 = shalt.err (!%p961_p10)
}
  0x6d   : > { %787 = dma.hbm_to_vmem [thread:$0]  (!%p1198_p7), %s1194_s28, 128, %s1196_s16, %s217_s21  }
  0x6e   : > { %p1297_p6 = scmp.ne.s32.totalorder %s1293_s24, 0 }
  0x6f   : > { %s238_s15 = sand.u32 (!%p1297_p6), 1, %s999_s19   ;;  %p1298_p2 = scmp.ne.s32.totalorder (!%p1297_p6), %s1292_s23, 0 }
  0x70   : > { %236 = sbr.rel (%p1297_p6) target bundleno = 783 (0x30f), region = 40  ;;  %s669_s18 = sshll.u32 (!%p1297_p6), %s238_s15, 3 }
  0x71   : > { %s239_s25 = scalar_lea.sflag (!%p1297_p6), [#allocation3], %s238_s15  ;;  %s242_s6 = scalar_lea.vmem (!%p1297_p6), [#allocation2], %s669_s18 }
  0x77   : > { %982 = dma.done.wait (%p1298_p2), %s239_s25, 128  }
  0x78   : > { %984 = vsyncadd (%p1298_p2), %s239_s25, 4294967168  ;;  %p1299_p1 = scmp.eq.s32.totalorder %s1066_s22, 0 }
  0x7a   : > { %986 = dma.done.wait (%p1299_p1), [#allocation5], 1152   ;;  %p1300_p11 = pmov %p1299_p1 }
  0x7b   : > { %p1301_p7 = pmov %p1299_p1 }
  0x7c   : > { %988 = vsyncadd (%p1300_p11), [#allocation5], 4294966144 }
  0x7d   : > { %990 = dma.done.wait (%p1301_p7), [#allocation8], 1024   ;;  %p1302_p4 = pmov %p1299_p1 }
  0x7e   : > { %v1015_v0 = vmov 0.0   ;;  %vm1016_vm0 = vmmov 0   ;;  %v834_v1 = vld [vmem:[#allocation4] sm:$0xff]   ;;  %v285_v2 = vld [vmem:[%s242_s6] sm:$0xff]  ;;  %vm300_vm1 = vcmask 130048   ;;  %v835_v4 = vld [vmem:[#allocation6] sm:$0xff]   ;;  %v290_v18 = vlaneseq }
  0x7f   : > { %992 = vsyncadd (%p1302_p4), [#allocation8], 4294966272  ;;  %714 = vmatprep.subr.bf16.mxu0 %v1015_v0  ;;  %716 = vmatprep.mubr.msk.bf16.mxu0 %vm1016_vm0, %v1015_v0  ;;  %v286_v3 = vpack.c.bf16 %v285_v2, %v285_v2  ;;  %v836_v5 = vld [vmem:[#allocation6 + $0x8] sm:$0xff]   ;;  %v837_v6 = vld [vmem:[#allocation6 + $0x10] sm:$0xff]   ;;  %p280_p5 = scmp.lt.s32.totalorder %s1066_s22, 1  ;;  %vm564_vm2 = vcmask 15360  }
  0x80   : > { %720 = vmatprep.subr.bf16.mxu1 %v1015_v0  ;;  %736 = vmatprep.mubr.msk.bf16.mxu1 %vm1016_vm0, %v1015_v0  ;;  %v838_v7 = vld [vmem:[#allocation6 + $0x18] sm:$0xff]   ;;  %v839_v8 = vld [vmem:[#allocation6 + $0x20] sm:$0xff]   ;;  %v840_v9 = vld [vmem:[#allocation6 + $0x28] sm:$0xff]   ;;  %v291_v19 = vshrl.u32 %v290_v18, 7 }
  0x81   : > { %715 = vmatpush3.bf16.msra.mxu0 %v834_v1  ;;  %721 = vmatpush3.bf16.msra.mxu1 %v835_v4  ;;  %v841_v10 = vld [vmem:[#allocation6 + $0x30] sm:$0xff]   ;;  %v842_v11 = vld [vmem:[#allocation6 + $0x38] sm:$0xff]   ;;  %v843_v12 = vld [vmem:[#allocation7] sm:$0xff]   ;;  %s1308_s22 = smov (!%p280_p5, %s1066_s22), 1 }
  0x82   : > { %740 = vmatprep.subr.bf16.mxu0 %v1015_v0  ;;  %722 = vmatprep.subr.bf16.mxu1 %v1015_v0  ;;  %v844_v13 = vld [vmem:[#allocation7 + $0x8] sm:$0xff]   ;;  %v845_v14 = vld [vmem:[#allocation7 + $0x10] sm:$0xff]   ;;  %v846_v15 = vld [vmem:[#allocation7 + $0x18] sm:$0xff]   ;;  %v292_v20 = vsub.s32 0, %v291_v19  ;;  %v364_v32 = vsub.s32 1, %v291_v19  ;;  %v474_v41 = vsub.s32 2, %v291_v19 }
  0x83   : > { %v847_v16 = vld [vmem:[#allocation7 + $0x20] sm:$0xff]   ;;  %v848_v17 = vld [vmem:[#allocation7 + $0x28] sm:$0xff]   ;;  %v849_v30 = vld [vmem:[#allocation7 + $0x30] sm:$0xff]   ;;  %s673_s28 = sshll.u32 %s1308_s22, 3 }
  0x84   : > { %717 = vmatmul.mubr.msk.bf16.vlgmr.msra.gmra.mrb[0].mxu0 %vm300_vm1, %v286_v3  ;;  %v287_v21 = vld [vmem:[%s1287_s4] sm:$0x7]  ;;  %v850_v31 = vld [vmem:[#allocation7 + $0x38] sm:$0xff]   ;;  %s283_s21 = scalar_lea.vmem %s1288_s5, %s673_s28 }
  0x85   : > { %756 = vmatprep.mubr.msk.bf16.mxu0 %vm1016_vm0, %v1015_v0  ;;  %723 = vmatpush3.bf16.msra.mxu1 %v836_v5  ;;  %v293_v22 = vrot.slane %v287_v21, %v292_v20  ;;  %v365_v33 = vrot.slane %v287_v21, %v364_v32  ;;  %v475_v42 = vrot.slane %v287_v21, %v474_v41 }
  0x86   : > { %724 = vmatprep.subr.bf16.mxu1 %v1015_v0  ;;  %741 = vmatpush3.bf16.msra.mxu0 %v843_v12 }
  0x87   : > { %742 = vmatprep.subr.bf16.mxu0 %v1015_v0 }
  0x89   : > { %725 = vmatpush3.bf16.msra.mxu1 %v837_v6 }
  0x8a   : > { %726 = vmatprep.subr.bf16.mxu1 %v1015_v0  ;;  %743 = vmatpush3.bf16.msra.mxu0 %v844_v13 }
  0x8b   : > { %744 = vmatprep.subr.bf16.mxu0 %v1015_v0 }
  0x8d   : > { %727 = vmatpush3.bf16.msra.mxu1 %v838_v7 }
  0x8e   : > { %728 = vmatprep.subr.bf16.mxu1 %v1015_v0  ;;  %745 = vmatpush3.bf16.msra.mxu0 %v845_v14 }
  0x8f   : > { %746 = vmatprep.subr.bf16.mxu0 %v1015_v0 }
  0x91   : > { %729 = vmatpush3.bf16.msra.mxu1 %v839_v8 }
  0x92   : > { %730 = vmatprep.subr.bf16.mxu1 %v1015_v0  ;;  %747 = vmatpush3.bf16.msra.mxu0 %v846_v15 }
  0x93   : > { %748 = vmatprep.subr.bf16.mxu0 %v1015_v0 }
  0x95   : > { %731 = vmatpush3.bf16.msra.mxu1 %v840_v9 }
  0x96   : > { %732 = vmatprep.subr.bf16.mxu1 %v1015_v0  ;;  %749 = vmatpush3.bf16.msra.mxu0 %v847_v16 }
  0x97   : > { %750 = vmatprep.subr.bf16.mxu0 %v1015_v0 }
  0x99   : > { %733 = vmatpush3.bf16.msra.mxu1 %v841_v10 }
  0x9a   : > { %734 = vmatprep.subr.bf16.mxu1 %v1015_v0  ;;  %751 = vmatpush3.bf16.msra.mxu0 %v848_v17 }
  0x9b   : > { %752 = vmatprep.subr.bf16.mxu0 %v1015_v0 }
  0x9d   : > { %735 = vmatpush3.bf16.msra.mxu1 %v842_v11 }
  0x9e   : > { %753 = vmatpush3.bf16.msra.mxu0 %v849_v30 }
  0x9f   : > { %754 = vmatprep.subr.bf16.mxu0 %v1015_v0 }
  0xa2   : > { %755 = vmatpush3.bf16.msra.mxu0 %v850_v31 }
 0x157   : > { %v338_v23 = vpop.f32.mrb[0].mxu0 }
 0x158   : > { %v339_v24 = vadd.f32 %v338_v23, %v293_v22  ;;  %v718_v25 = vpop.f32.mrb[1].mxu0 }
 0x159   : > { %v341_v26 = vpop.f32.mrb[2].mxu0 }
 0x15a   : > { %v344_v27 = vmax.f32 %v339_v24, 0.0  ;;  %v719_v28 = vpop.f32.mrb[3].mxu0 }
 0x15c   : > { %v345_v29 = vpack.c.bf16 %v344_v27, %v344_v27 }
 0x15e   : > { %737 = vmatmul.mubr.bf16.vlgmr.msra.gmra.mrb[0].mxu1 %v345_v29 }
 0x231   : > { %v448_v34 = vpop.f32.mrb[0].mxu1 }
 0x232   : > { %v449_v35 = vadd.f32 %v448_v34, %v365_v33  ;;  %v738_v36 = vpop.f32.mrb[1].mxu1 }
 0x233   : > { %v451_v37 = vpop.f32.mrb[2].mxu1 }
 0x234   : > { %v454_v38 = vmax.f32 %v449_v35, 0.0  ;;  %v739_v39 = vpop.f32.mrb[3].mxu1 }
 0x236   : > { %v455_v40 = vpack.c.bf16 %v454_v38, %v454_v38 }
 0x238   : > { %757 = vmatmul.mubr.bf16.vlgmr.msra.gmra.mrb[4].mxu0 %v455_v40 }
 0x30b   : > { %v558_v43 = vpop.f32.mrb[4].mxu0 }
 0x30c   : > { %v559_v44 = vadd.f32 %v558_v43, %v475_v42  ;;  %v758_v45 = vpop.f32.mrb[5].mxu0 }
 0x30d   : > { %v561_v46 = vpop.f32.mrb[6].mxu0 }
 0x30e   : > { %565 = vst.msk [vmem:[%s283_s21] sm:$0xff] %vm564_vm2, %v559_v44  ;;  %v759_v47 = vpop.f32.mrb[7].mxu0 }
 0x30f PF: > { %p17_p9 = scmp.ge.s32.totalorder %s1177_s12, 4   ;;  %s1303_s18 = smov %s999_s19 }
 0x310   : > { %s1304_s19 = smov %s1003_s20  ;;  %s1305_s20 = smov %s1187_s26 }
 0x311   : > { %s1306_s21 = smov %s1177_s12  ;;  %19 = sbr.rel (!%p17_p9) target bundleno = 5 (0x5), region = 92 }
 0x318   :  { %585 = vsyncpa [#allocation3], 1 }
 0x319   :  { %587 = vsyncpa [#allocation3 + $0x1], 1 }
 0x31a   :  { %588 = vsyncpa [#allocation5], 1 }
 0x31b   :  { %589 = vsyncpa [#allocation8], 1 }

</bundles_post_ra>
